<compile_context>
chip_gen: v6e
topology: v6e:2x2x1
jax: 0.10.0
libtpu: 0.0.40
codegen_flags: <defaults>
</compile_context>

<pallas_src>
import functools

import jax
import jax.numpy as jnp
from jax.experimental import pallas as pl
from jax.experimental.pallas import tpu as pltpu


def attention_kernel(q_ref, c_ref, m_ref, wt_ref, out_ref, wts_ref, *scratch,
                     d, lq, fuse_linear):
    q = q_ref[...]            # [BB, Lo, D]   compute dtype
    c = c_ref[...]            # [BB, Lq, D]   compute dtype
    m = m_ref[...]            # [BB, Lo, 1]   f32; 0 => masked

    bb, lo, _ = q.shape

    # ---- attention scores ----------------------------------------------------
    if lq == 1:
        # Canonical path: an N=1 matmul would leave the MXU ~1% utilized, so use
        # a VPU multiply + lane (XLU) reduce instead.  Math kept in f32.
        scores = jnp.sum(q.astype(jnp.float32) * c.astype(jnp.float32),
                         axis=-1, keepdims=True)                    # [BB, Lo, 1]
    else:
        scores = jnp.einsum('bld,bqd->blq', q, c,
                            preferred_element_type=jnp.float32)     # [BB, Lo, Lq]
    scores = jnp.where(m == 0.0, -jnp.inf, scores)

    # ---- softmax over the output-length axis (nn.Softmax(dim=1)), once -------
    s_max = jnp.max(scores, axis=1, keepdims=True)
    p = jnp.exp(scores - s_max)
    denom = jnp.sum(p, axis=1, keepdims=True)
    wts = p * pl.reciprocal(denom, approx=False)                    # [BB, Lo, Lq]
    # The returned weights are exactly the ones used to compute `mix`.
    wts_ref[...] = wts.astype(wts_ref.dtype)

    # ---- mix = weights @ context ---------------------------------------------
    if lq == 1:
        mix = wts * c.astype(jnp.float32)                           # [BB, Lo, D] (VPU)
    else:
        mix = jnp.einsum('blq,bqd->bld', wts.astype(c.dtype), c,
                         preferred_element_type=jnp.float32)        # [BB, Lo, D]

    # ---- output = tanh(linear_out(cat([mix, query], -1))) ---------------------
    cdtype = wt_ref.dtype
    if fuse_linear:
        # D < 128: stage [mix | q] so a single MXU pass sees K = 2D.
        cat_ref = scratch[0]                                        # [BB, Lo, 2D]
        cat_ref[:, :, :d] = mix.astype(cdtype)
        cat_ref[:, :, d:] = q.astype(cdtype)
        combined = cat_ref[...].reshape(bb * lo, 2 * d)
        out2 = jnp.dot(combined, wt_ref[...],
                       preferred_element_type=jnp.float32)          # [BB*Lo, D]
    else:
        mix2 = mix.astype(cdtype).reshape(bb * lo, d)
        q2 = q.astype(cdtype).reshape(bb * lo, d)
        out2 = (jnp.dot(mix2, wt_ref[:d, :], preferred_element_type=jnp.float32)
                + jnp.dot(q2, wt_ref[d:, :], preferred_element_type=jnp.float32))
    out_ref[...] = jnp.tanh(out2).reshape(bb, lo, d).astype(out_ref.dtype)


def _round_up(x, m):
    return (x + m - 1) // m * m


def _chip_info():
    """(vmem_capacity_bytes, two_tensorcores?) with safe fallbacks."""
    vmem_cap = None
    try:
        info = pltpu.get_tpu_info()
        for name in ("vmem_capacity_bytes", "vmem_bytes", "vmem_size_bytes"):
            v = getattr(info, name, None)
            if v:
                vmem_cap = int(v)
                break
    except Exception:
        pass
    if not vmem_cap:
        vmem_cap = 128 << 20
    kind = ""
    try:
        kind = jax.devices()[0].device_kind.lower()
    except Exception:
        pass
    two_cores = (vmem_cap <= (64 << 20)) or ("v7" in kind)
    return vmem_cap, two_cores


def _block_plan(B, L_out, L_q, D, in_itemsize, out_itemsize, wts_itemsize):
    """Pick per-grid-step batch block bb, step count, and a scoped-VMEM limit."""
    vmem_cap, two_cores = _chip_info()
    # v7x: 64 MiB/TC -> leave headroom; v5e/v6e: 128 MiB physical -> ~100 MiB.
    vmem_limit = (48 << 20) if two_cores else (100 << 20)
    vmem_limit = min(vmem_limit, vmem_cap)

    lo8 = _round_up(L_out, 8)
    lq8 = _round_up(max(L_q, 1), 8)
    d128 = _round_up(D, 128)
    d2_128 = _round_up(2 * D, 128)
    lq128 = _round_up(max(L_q, 1), 128)

    # Pipelined (double-buffered) per-batch-element block bytes.
    per_b = (lo8 * d128 * in_itemsize                 # query block
             + lq8 * d128 * in_itemsize               # context block
             + lo8 * 128 * 4                          # mask block (col, lane-padded)
             + lo8 * lq128 * wts_itemsize             # weights output block
             + lo8 * d128 * out_itemsize)             # attended output block
    per_b *= 2
    # Rough f32 in-kernel intermediates (scores/p, mix, pre-tanh).
    per_b += lo8 * max(lq128 if L_q > 1 else 128, 128) * 4 * 2
    per_b += lo8 * d128 * 4 * 2
    if D < 128:
        per_b += lo8 * d2_128 * in_itemsize           # fused-linear staging buffer

    w_bytes = 2 * _round_up(2 * D, 8) * d128 * in_itemsize  # resident wt (x2 buffers)

    budget = int(vmem_limit * 0.7) - w_bytes
    bb = max(1, min(B, budget // max(per_b, 1)))
    # Fill the MXU M dim (bb*L_out ~ 256) for the final linear, but cap vreg /
    # compile pressure.
    cap = max(32, pl.cdiv(256, max(L_out, 1)))
    bb = min(bb, cap)

    n_steps = pl.cdiv(B, bb)
    if two_cores and B >= 2:
        if n_steps == 1:                # keep >= 2 "parallel" steps for megacore
            bb = pl.cdiv(B, 2)
            n_steps = 2
        if n_steps % 2 == 1:            # even step count across the 2 TCs
            n_steps += 1
    return bb, n_steps, vmem_limit


def attention(query, context, attention_mask, w, *,
              matmul_dtype=jnp.bfloat16, weights_dtype=jnp.float32,
              out_dtype=None):
    """query: [B, L_out, D]; context: [B, L_q, D]; attention_mask: [B, L_out] (or None);
    w: [D, 2D] (nn.Linear(2D, D, bias=False).weight)."""
    B, L_out, D = query.shape
    Bc, L_q, Dc = context.shape
    assert Bc == B and Dc == D
    assert w.shape == (D, 2 * D)
    if attention_mask is None:
        attention_mask = jnp.ones((B, L_out), jnp.float32)

    if out_dtype is None:
        out_dtype = query.dtype
    compute_dtype = matmul_dtype if matmul_dtype is not None else query.dtype

    bb, n_steps, vmem_limit = _block_plan(
        B, L_out, L_q, D,
        in_itemsize=jnp.dtype(compute_dtype).itemsize,
        out_itemsize=jnp.dtype(out_dtype).itemsize,
        wts_itemsize=jnp.dtype(weights_dtype).itemsize)
    Bp = n_steps * bb

    mask_f = attention_mask.astype(jnp.float32)
    q = query.astype(compute_dtype)
    c = context.astype(compute_dtype)
    if Bp != B:
        pad = Bp - B
        q = jnp.pad(q, ((0, pad), (0, 0), (0, 0)))
        c = jnp.pad(c, ((0, pad), (0, 0), (0, 0)))
        # Padded rows get mask=1 so padded work stays finite; sliced off below.
        mask_f = jnp.pad(mask_f, ((0, pad), (0, 0)), constant_values=1.0)
    m_col = mask_f[:, :, None]                                # [Bp, L_out, 1]

    # Pre-transpose the linear weight once (grid-invariant, done in XLA).
    wt = jnp.transpose(w).astype(compute_dtype)               # [2D, D]

    fuse_linear = D < 128
    kernel = functools.partial(attention_kernel, d=D, lq=L_q,
                               fuse_linear=fuse_linear)
    scratch = ([pltpu.VMEM((bb, L_out, 2 * D), compute_dtype)]
               if fuse_linear else [])

    out, wts = pl.pallas_call(
        kernel,
        out_shape=(
            jax.ShapeDtypeStruct((Bp, L_out, D), out_dtype),        # attended output
            jax.ShapeDtypeStruct((Bp, L_out, L_q), weights_dtype),  # attention weights
        ),
        grid_spec=pltpu.PrefetchScalarGridSpec(
            num_scalar_prefetch=0,
            grid=(n_steps,),
            in_specs=[
                pl.BlockSpec((bb, L_out, D), lambda b: (b, 0, 0)),   # query
                pl.BlockSpec((bb, L_q, D), lambda b: (b, 0, 0)),     # context
                pl.BlockSpec((bb, L_out, 1), lambda b: (b, 0, 0)),   # mask (col)
                pl.BlockSpec((2 * D, D), lambda b: (0, 0)),          # wt (resident)
            ],
            out_specs=[
                pl.BlockSpec((bb, L_out, D), lambda b: (b, 0, 0)),
                pl.BlockSpec((bb, L_out, L_q), lambda b: (b, 0, 0)),
            ],
            scratch_shapes=scratch,
        ),
        compiler_params=pltpu.CompilerParams(
            dimension_semantics=("parallel",),
            vmem_limit_bytes=vmem_limit,
        ),
    )(q, c, m_col, wt)

    return out[:B], wts[:B]


def _reference(query, context, mask, w):
    scores = jnp.einsum('bld,bqd->blq', query, context)
    scores = jnp.where(mask[:, :, None] == 0, -jnp.inf, scores)
    ref_w = jax.nn.softmax(scores, axis=1)               # dim=1 == output-length axis
    mix = jnp.einsum('blq,bqd->bld', ref_w, context)
    combined = jnp.concatenate([mix, query], axis=-1)
    ref_out = jnp.tanh(jnp.einsum('blk,dk->bld', combined, w))
    return ref_out, ref_w


if __name__ == "__main__":
    key = jax.random.PRNGKey(0)
    kq, kc, km, kw = jax.random.split(key, 4)

    # Small shapes consistent with the module docstring (context query-length = 1).
    B, L_out, L_q, D = 2, 8, 1, 32
    query = jax.random.normal(kq, (B, L_out, D), jnp.float32)
    context = jax.random.normal(kc, (B, L_q, D), jnp.float32)
    mask = (jax.random.uniform(km, (B, L_out)) > 0.3).astype(jnp.float32)
    mask = mask.at[:, 0].set(1.0)   # keep >=1 unmasked position per batch row

    # nn.Linear(2D, D, bias=False) weight: shape [D, 2D].
    bound = 1.0 / jnp.sqrt(2.0 * D)
    w = jax.random.uniform(kw, (D, 2 * D), jnp.float32, -bound, bound)

    ref_out, ref_w = _reference(query, context, mask, w)

    # ---- exact-precision (f32 operands) path: canonical L_q == 1 --------------
    out, wts = attention(query, context, mask, w, matmul_dtype=jnp.float32)
    jax.block_until_ready((out, wts))
    assert out.shape == (B, L_out, D) and wts.shape == (B, L_out, L_q)
    assert jnp.allclose(out, ref_out, atol=1e-5), "output mismatch (f32)"
    assert jnp.allclose(wts, ref_w, atol=1e-5), "weights mismatch (f32)"

    # ---- default bf16-operand path (f32 accumulation / softmax) ---------------
    out_bf, wts_bf = attention(query, context, mask, w)
    jax.block_until_ready((out_bf, wts_bf))
    assert jnp.allclose(out_bf, ref_out, atol=7.5e-2), "output mismatch (bf16)"
    assert jnp.allclose(wts_bf, ref_w, atol=7.5e-2), "weights mismatch (bf16)"

    # ---- general L_q > 1 path (MXU einsums, single softmax) -------------------
    L_q2 = 4
    context2 = jax.random.normal(kc, (B, L_q2, D), jnp.float32)
    ref_out2, ref_w2 = _reference(query, context2, mask, w)
    out2, wts2 = attention(query, context2, mask, w, matmul_dtype=jnp.float32)
    jax.block_until_ready((out2, wts2))
    assert out2.shape == (B, L_out, D) and wts2.shape == (B, L_out, L_q2)
    assert jnp.allclose(out2, ref_out2, atol=1e-5), "output mismatch (L_q>1)"
    assert jnp.allclose(wts2, ref_w2, atol=1e-5), "weights mismatch (L_q>1)"

    print("KERNEL_OK")
</pallas_src>

<mosaic_0001>
module attributes {stable_mosaic.version = 11 : i64} {
  func.func @attention_kernel(%arg0: i32, %arg1: memref<2x8x32xf32, #tpu.memory_space<vmem>>, %arg2: memref<2x1x32xf32, #tpu.memory_space<vmem>>, %arg3: memref<2x8x1xf32, #tpu.memory_space<vmem>>, %arg4: memref<64x32xf32, #tpu.memory_space<vmem>>, %arg5: memref<2x8x32xf32, #tpu.memory_space<vmem>>, %arg6: memref<2x8x1xf32, #tpu.memory_space<vmem>>, %arg7: memref<2x8x64xf32, #tpu.memory_space<vmem>>) attributes {dimension_semantics = [#tpu.dimension_semantics<parallel>], iteration_bounds = array<i64: 1>, scalar_prefetch = 0 : i64, scratch_operands = 1 : i64, tpu.core_type = #tpu.core_type<tc>, window_params = [{transform_indices = @transform_0, window_bounds = array<i64: 2, 8, 32>}, {transform_indices = @transform_1, window_bounds = array<i64: 2, 1, 32>}, {transform_indices = @transform_2, window_bounds = array<i64: 2, 8, 1>}, {pipeline_mode = #tpu.pipeline_mode<synchronous>, transform_indices = @transform_3, window_bounds = array<i64: 64, 32>}, {transform_indices = @transform_4, window_bounds = array<i64: 2, 8, 32>}, {transform_indices = @transform_5, window_bounds = array<i64: 2, 8, 1>}]} {
    %c0 = arith.constant 0 : index
    %c0_0 = arith.constant 0 : index
    %c0_1 = arith.constant 0 : index
    %0 = vector.load %arg1[%c0, %c0_0, %c0_1] : memref<2x8x32xf32, #tpu.memory_space<vmem>>, vector<2x8x32xf32>
    %c0_2 = arith.constant 0 : index
    %c0_3 = arith.constant 0 : index
    %c0_4 = arith.constant 0 : index
    %1 = vector.load %arg2[%c0_2, %c0_3, %c0_4] : memref<2x1x32xf32, #tpu.memory_space<vmem>>, vector<2x1x32xf32>
    %c0_5 = arith.constant 0 : index
    %c0_6 = arith.constant 0 : index
    %c0_7 = arith.constant 0 : index
    %2 = vector.load %arg3[%c0_5, %c0_6, %c0_7] : memref<2x8x1xf32, #tpu.memory_space<vmem>>, vector<2x8x1xf32>
    %3 = vector.broadcast %1 : vector<2x1x32xf32> to vector<2x8x32xf32>
    %4 = arith.mulf %0, %3 : vector<2x8x32xf32>
    %cst = arith.constant dense<0.000000e+00> : vector<2x8xf32>
    %5 = vector.multi_reduction <add>, %4, %cst [2] : vector<2x8x32xf32> to vector<2x8xf32>
    %6 = vector.shape_cast %5 : vector<2x8xf32> to vector<2x8x1xf32>
    %cst_8 = arith.constant 0.000000e+00 : f32
    %7 = vector.broadcast %cst_8 : f32 to vector<2x8x1xf32>
    %8 = arith.cmpf oeq, %2, %7 : vector<2x8x1xf32>
    %cst_9 = arith.constant 0xFF800000 : f32
    %9 = vector.broadcast %cst_9 : f32 to vector<2x8x1xf32>
    %10 = arith.select %8, %9, %6 : vector<2x8x1xi1>, vector<2x8x1xf32>
    %cst_10 = arith.constant dense<0xFF800000> : vector<2x1xf32>
    %11 = vector.multi_reduction <maximumf>, %10, %cst_10 [1] : vector<2x8x1xf32> to vector<2x1xf32>
    %12 = vector.shape_cast %11 : vector<2x1xf32> to vector<2x1x1xf32>
    %13 = vector.broadcast %12 : vector<2x1x1xf32> to vector<2x8x1xf32>
    %14 = arith.subf %10, %13 : vector<2x8x1xf32>
    %15 = math.exp %14 : vector<2x8x1xf32>
    %cst_11 = arith.constant dense<0.000000e+00> : vector<2x1xf32>
    %16 = vector.multi_reduction <add>, %15, %cst_11 [1] : vector<2x8x1xf32> to vector<2x1xf32>
    %17 = vector.shape_cast %16 : vector<2x1xf32> to vector<2x1x1xf32>
    %18 = tpu.reciprocal %17 : vector<2x1x1xf32> -> vector<2x1x1xf32>
    %19 = vector.broadcast %18 : vector<2x1x1xf32> to vector<2x8x1xf32>
    %20 = arith.mulf %15, %19 : vector<2x8x1xf32>
    %c0_12 = arith.constant 0 : index
    %c0_13 = arith.constant 0 : index
    %c0_14 = arith.constant 0 : index
    %21 = vector.load %arg6[%c0_12, %c0_13, %c0_14] : memref<2x8x1xf32, #tpu.memory_space<vmem>>, vector<2x8x1xf32>
    tpu.vector_store %arg6[%c0_12, %c0_13, %c0_14], %20 {strides = array<i32>} : memref<2x8x1xf32, #tpu.memory_space<vmem>>, vector<2x8x1xf32>,
    %22 = vector.broadcast %20 : vector<2x8x1xf32> to vector<2x8x32xf32>
    %23 = vector.broadcast %1 : vector<2x1x32xf32> to vector<2x8x32xf32>
    %24 = arith.mulf %22, %23 : vector<2x8x32xf32>
    %c0_15 = arith.constant 0 : index
    %c0_16 = arith.constant 0 : index
    %c0_17 = arith.constant 0 : index
    %25 = vector.load %arg7[%c0_15, %c0_16, %c0_17] : memref<2x8x64xf32, #tpu.memory_space<vmem>>, vector<2x8x32xf32>
    tpu.vector_store %arg7[%c0_15, %c0_16, %c0_17], %24 {strides = array<i32>} : memref<2x8x64xf32, #tpu.memory_space<vmem>>, vector<2x8x32xf32>,
    %c0_18 = arith.constant 0 : index
    %c0_19 = arith.constant 0 : index
    %c32 = arith.constant 32 : index
    %26 = vector.load %arg7[%c0_18, %c0_19, %c32] : memref<2x8x64xf32, #tpu.memory_space<vmem>>, vector<2x8x32xf32>
    tpu.vector_store %arg7[%c0_18, %c0_19, %c32], %0 {strides = array<i32>} : memref<2x8x64xf32, #tpu.memory_space<vmem>>, vector<2x8x32xf32>,
    %c0_20 = arith.constant 0 : index
    %c0_21 = arith.constant 0 : index
    %c0_22 = arith.constant 0 : index
    %27 = vector.load %arg7[%c0_20, %c0_21, %c0_22] : memref<2x8x64xf32, #tpu.memory_space<vmem>>, vector<2x8x64xf32>
    %28 = vector.shape_cast %27 : vector<2x8x64xf32> to vector<16x64xf32>
    %c0_23 = arith.constant 0 : index
    %c0_24 = arith.constant 0 : index
    %29 = vector.load %arg4[%c0_23, %c0_24] : memref<64x32xf32, #tpu.memory_space<vmem>>, vector<64x32xf32>
    %cst_25 = arith.constant dense<0.000000e+00> : vector<16x32xf32>
    %30 = tpu.matmul %28, %29, %cst_25 {dimension_numbers = #tpu.dot_dimension_numbers<[1], [0], [0], [1], [0, 0, 1, 1], [], []>} : vector<16x64xf32>, vector<64x32xf32>, vector<16x32xf32> -> vector<16x32xf32>
    %31 = math.tanh %30 : vector<16x32xf32>
    %32 = vector.shape_cast %31 : vector<16x32xf32> to vector<2x8x32xf32>
    %c0_26 = arith.constant 0 : index
    %c0_27 = arith.constant 0 : index
    %c0_28 = arith.constant 0 : index
    %33 = vector.load %arg5[%c0_26, %c0_27, %c0_28] : memref<2x8x32xf32, #tpu.memory_space<vmem>>, vector<2x8x32xf32>
    tpu.vector_store %arg5[%c0_26, %c0_27, %c0_28], %32 {strides = array<i32>} : memref<2x8x32xf32, #tpu.memory_space<vmem>>, vector<2x8x32xf32>,
    return
  }
  func.func @transform_0(%arg0: i32) -> (i32, i32, i32) {
    %c0_i32 = arith.constant 0 : i32
    %c0_i32_0 = arith.constant 0 : i32
    %c0_i32_1 = arith.constant 0 : i32
    return %arg0, %c0_i32, %c0_i32_0 : i32, i32, i32
  }
  func.func @transform_1(%arg0: i32) -> (i32, i32, i32) {
    %c0_i32 = arith.constant 0 : i32
    %c0_i32_0 = arith.constant 0 : i32
    %c0_i32_1 = arith.constant 0 : i32
    return %arg0, %c0_i32, %c0_i32_0 : i32, i32, i32
  }
  func.func @transform_2(%arg0: i32) -> (i32, i32, i32) {
    %c0_i32 = arith.constant 0 : i32
    %c0_i32_0 = arith.constant 0 : i32
    %c0_i32_1 = arith.constant 0 : i32
    return %arg0, %c0_i32, %c0_i32_0 : i32, i32, i32
  }
  func.func @transform_3(%arg0: i32) -> (i32, i32) {
    %c0_i32 = arith.constant 0 : i32
    %c0_i32_0 = arith.constant 0 : i32
    %c0_i32_1 = arith.constant 0 : i32
    return %c0_i32, %c0_i32_0 : i32, i32
  }
  func.func @transform_4(%arg0: i32) -> (i32, i32, i32) {
    %c0_i32 = arith.constant 0 : i32
    %c0_i32_0 = arith.constant 0 : i32
    %c0_i32_1 = arith.constant 0 : i32
    return %arg0, %c0_i32, %c0_i32_0 : i32, i32, i32
  }
  func.func @transform_5(%arg0: i32) -> (i32, i32, i32) {
    %c0_i32 = arith.constant 0 : i32
    %c0_i32_0 = arith.constant 0 : i32
    %c0_i32_1 = arith.constant 0 : i32
    return %arg0, %c0_i32, %c0_i32_0 : i32, i32, i32
  }
}

</mosaic_0001>

<bundles_post_ra>
// kernel: tpu_custom_call.1
= control target key start
LH: loop header
LB: loop body
LE: loop exit
PB: predicated region body
PF: predicated region fallthrough
CT: control target
= control target key end

     0   :  { %vm40_vm0 = vcmask 261120   ;;  %s419_s0 = inlined_call_operand.vmem [shape: f32[2,8,32], index: 0, kind: input, shape index: {}]   ;;  %s420_s1 = inlined_call_operand.vmem [shape: f32[2,1,32], index: 1, kind: input, shape index: {}]   ;;  %s421_s2 = inlined_call_operand.vmem [shape: f32[2,8,1], index: 2, kind: input, shape index: {}]   ;;  %s422_s3 = inlined_call_operand.vmem [shape: f32[64,32], index: 3, kind: input, shape index: {}]   ;;  %s423_s4 = inlined_call_operand.hbm [shape: f32[2,8,32], index: 4, kind: output, shape index: {0}]   ;;  %s424_s5 = inlined_call_operand.vmem [shape: f32[2,8,1], index: 5, kind: output, shape index: {1}]  }
   0x1   :  { %v20_v0 = vld [vmem:[%s419_s0] sm:$0xff]  ;;  %v353_v2 = vld [vmem:[%s419_s0 + $0x8] sm:$0xff] }
   0x2   :  { %v348_v1 = vld [vmem:[%s420_s1] ss:$0 sm:$0xff]  ;;  %v359_v4 = vld [vmem:[%s420_s1 + $0x1] ss:$0 sm:$0xff] }
   0x3   :  { %v38_v3 = vmul.f32 %v348_v1, %v20_v0 }
   0x4   :  { %11 = vsyncpa [#allocation4], 0  ;;  %v39_v5 = vmul.f32 %v359_v4, %v353_v2  ;;  %v307_v8 = vmov 0   ;;  %s308_s0 = smov 32   ;;  %v24_v9 = vld [vmem:[%s421_s2] sm:$0xff]  ;;  %vm51_vm2 = vcmask 7168  }
   0x5   :  { %v41_v6 = vsel %vm40_vm0, %v38_v3, 0.0  ;;  %271 = vset.pattern.permute.xlu1 %v307_v8  ;;  %272 = vset.pattern.permute.xlu0 %v307_v8  ;;  %vm47_vm1 = vcmp.eq.f32.partialorder %v24_v9, 0.0  ;;  %v25_v10 = vld [vmem:[%s421_s2 + $0x8] sm:$0xff]  ;;  %v126_v49 = vld [vmem:[%s422_s3 + $0x38] sm:$0xff]  ;;  %v125_v51 = vld [vmem:[%s422_s3 + $0x30] sm:$0xff]  ;;  %vm114_vm4 = vcmask 523520  }
   0x6   :  { %42 = vadd.xlane.f32.xlu0 %v41_v6  ;;  %v44_v7 = vsel %vm40_vm0, %v39_v5, 0.0  ;;  %vm48_vm3 = vcmp.eq.f32.partialorder %v25_v10, 0.0  ;;  %247 = vmatprep.subr.mxu0 %v126_v49  ;;  %v124_v53 = vld [vmem:[%s422_s3 + $0x28] sm:$0xff]  ;;  %v123_v55 = vld [vmem:[%s422_s3 + $0x20] sm:$0xff]  ;;  %v122_v57 = vld [vmem:[%s422_s3 + $0x18] sm:$0xff]  ;;  %vm127_vm5 = vcmask 523264  }
   0x7   :  { %248 = vmatpush3.msra.mxu0 %v126_v49  ;;  %v121_v58 = vld [vmem:[%s422_s3 + $0x10] sm:$0xff]  ;;  %v120_v59 = vld [vmem:[%s422_s3 + $0x8] sm:$0xff]  ;;  %v119_v60 = vld [vmem:[%s422_s3] sm:$0xff]  ;;  %s309_s3 = smov [#allocation3]  }
   0x8   :  { %249 = vmatprep.subr.mxu0 %v125_v51 }
   0x9   :  { %250 = vmatpush3.msra.mxu0 %v125_v51 }
   0xa   :  { %45 = vadd.xlane.f32.xlu0 %v44_v7  ;;  %251 = vmatprep.subr.mxu0 %v124_v53 }
   0xb   :  { %252 = vmatpush3.msra.mxu0 %v124_v53 }
   0xc   :  { %253 = vmatprep.subr.mxu0 %v123_v55 }
   0xd   :  { %254 = vmatpush3.msra.mxu0 %v123_v55 }
   0xe   :  { %255 = vmatprep.subr.mxu0 %v122_v57 }
   0xf   :  { %256 = vmatpush3.msra.mxu0 %v122_v57 }
  0x10   :  { %257 = vmatprep.subr.mxu0 %v121_v58 }
  0x11   :  { %258 = vmatpush3.msra.mxu0 %v121_v58 }
  0x12   :  { %259 = vmatprep.subr.mxu0 %v120_v59 }
  0x13   :  { %260 = vmatpush3.msra.mxu0 %v120_v59 }
  0x14   :  { %261 = vmatprep.subr.mxu0 %v119_v60 }
  0x15   :  { %262 = vmatpush3.msra.mxu0 %v119_v60 }
  0x20   :  { %108 = vrot.lane.b32.xlu0 %v20_v0, %s308_s0 }
  0x8f   :  { %v43_v11 = vpop.xlane.xlu0 %42 }
  0x90   :  { %v49_v12 = vsel %vm47_vm1, -inf, %v43_v11 }
  0x91   :  { %v52_v13 = vsel %vm51_vm2, %v49_v12, -inf }
  0x92   :  { %v53_v14 = vrot.slane %v52_v13, 4 }
  0x93   :  { %v46_v15 = vpop.xlane.xlu0 %45 }
  0x94   :  { %v54_v16 = vmax.f32 %v52_v13, %v53_v14  ;;  %v50_v17 = vsel %vm48_vm3, -inf, %v46_v15 }
  0x95   :  { %v59_v18 = vsel %vm51_vm2, %v50_v17, -inf }
  0x96   :  { %v55_v19 = vrot.slane %v54_v16, 2  ;;  %v60_v20 = vrot.slane %v59_v18, 4 }
  0x97   :  { %v109_v63 = vpop.permute.xlu0 %108 }
  0x98   :  { %v56_v21 = vmax.f32 %v54_v16, %v55_v19  ;;  %v61_v22 = vmax.f32 %v59_v18, %v60_v20 }
  0x9a   :  { %v57_v23 = vrot.slane %v56_v21, 1  ;;  %v62_v24 = vrot.slane %v61_v22, 2 }
  0x9c   :  { %v58_v25 = vmax.f32 %v56_v21, %v57_v23  ;;  %v63_v26 = vmax.f32 %v61_v22, %v62_v24 }
  0x9e   :  { %v66_v27 = vsub.f32 %v49_v12, %v58_v25  ;;  %v64_v28 = vrot.slane %v63_v26, 1 }
  0xa0   :  { %v68_v29 = vmul.f32 1.442695, %v66_v27  ;;  %v65_v30 = vmax.f32 %v63_v26, %v64_v28 }
  0xa2   :  { %273 = vpow2.f32 %v68_v29  ;;  %v67_v31 = vsub.f32 %v50_v17, %v65_v30 }
  0xa4   :  { %v70_v32 = vmul.f32 1.442695, %v67_v31 }
  0xa6   :  { %275 = vpow2.f32 %v70_v32 }
  0xaf   :  { %v274_v33 = vpop.eup %273 }
  0xb0   :  { %v72_v34 = vsel %vm51_vm2, %v274_v33, 0.0 }
  0xb1   :  { %v73_v35 = vrot.slane %v72_v34, 4 }
  0xb3   :  { %v276_v36 = vpop.eup %275  ;;  %v74_v37 = vadd.f32 %v73_v35, %v72_v34 }
  0xb4   :  { %v79_v38 = vsel %vm51_vm2, %v276_v36, 0.0 }
  0xb5   :  { %v75_v39 = vrot.slane %v74_v37, 2  ;;  %v80_v40 = vrot.slane %v79_v38, 4 }
  0xb7   :  { %v81_v41 = vadd.f32 %v80_v40, %v79_v38  ;;  %v76_v42 = vadd.f32 %v75_v39, %v74_v37 }
  0xb9   :  { %v82_v43 = vrot.slane %v81_v41, 2  ;;  %v77_v44 = vrot.slane %v76_v42, 1 }
  0xbb   :  { %v83_v45 = vadd.f32 %v82_v43, %v81_v41  ;;  %v78_v46 = vadd.f32 %v77_v44, %v76_v42 }
  0xbd   :  { %277 = vrcp.f32 %v78_v46  ;;  %v84_v47 = vrot.slane %v83_v45, 1 }
  0xbf   :  { %v85_v48 = vadd.f32 %v84_v47, %v83_v45 }
  0xc1   :  { %279 = vrcp.f32 %v85_v48 }
  0xca   :  { %v278_v50 = vpop.eup %277 }
  0xcb   :  { %v88_v52 = vmul.f32 %v278_v50, %v274_v33 }
  0xcd   :  { %94 = vperm.xlu1 %271, %v88_v52   ;;  %90 = vst.msk [vmem:[%s424_s5] sm:$0xff] %vm51_vm2, %v88_v52 }
  0xce   :  { %v280_v54 = vpop.eup %279 }
  0xcf   :  { %v89_v56 = vmul.f32 %v280_v54, %v276_v36 }
  0xd1   :  { %99 = vperm.xlu1 %271, %v89_v56   ;;  %91 = vst.msk [vmem:[%s424_s5 + $0x8] sm:$0xff] %vm51_vm2, %v89_v56  ;;  %s218_s5 = sshll.u32 %s309_s3, 4  ;;  %s219_s5 = int_to_ptr.vmem [resolvable:$true] %s218_s5 }
  0xd2   :  { %s285_s23 = scalar_lea.vmem %s219_s5, 256  ;;  %p290_p1 = scmp.lt.s32.totalorder %s219_s5, %s219_s5 }
  0xd3   :  { %p286_p0 = scmp.ne.s32.totalorder %s219_s5, %s285_s23  ;;  %p291_p2 = scmp.lt.s32.totalorder %s285_s23, %s285_s23 }
  0xd5   :  { %110 = vrot.lane.b32.xlu1 %v353_v2, %s308_s0  ;;  %p292_p3 = por %p291_p2, %p290_p1 }
  0xd7   :  { %p293_p4 = pnand %p292_p3, %p286_p0 }
 0x148   :  { %v95_v61 = vpop.permute.xlu1 %94 }
 0x149   :  { %v102_v62 = vmul.f32 %v348_v1, %v95_v61 }
 0x14b   :  { %104 = vst.msk [vmem:[#allocation2] sm:$0xff] %vm40_vm0, %v102_v62 }
 0x14c   :  { %v100_v0 = vpop.permute.xlu1 %99  ;;  %115 = vst.msk [vmem:[#allocation2] sm:$0xff] %vm114_vm4, %v109_v63 }
 0x14d   :  { %v103_v3 = vmul.f32 %v359_v4, %v100_v0 }
 0x14f   :  { %105 = vst.msk [vmem:[#allocation2 + $0x8] sm:$0xff] %vm40_vm0, %v103_v3 }
 0x150   :  { %v111_v5 = vpop.permute.xlu1 %110 }
 0x151   :  { %116 = vst.msk [vmem:[#allocation2 + $0x8] sm:$0xff] %vm114_vm4, %v111_v5 }
 0x153   :  { %v117_v2 = vld [vmem:[#allocation2] sm:$0xff] }
 0x154   :  { %263 = vmatprep.mubr.msk.f32.mxu0 %vm127_vm5, %v117_v2 }
 0x158   :  { %v118_v6 = vld [vmem:[#allocation2 + $0x8] sm:$0xff] }
 0x159   :  { %264 = vmatmul.mubr.msk.f32.vlgmr.msra.gmra.mxu0 %vm127_vm5, %v118_v6 }
 0x219   :  { %v265_v7 = vpop.f32.mrf.mxu0 }
 0x21a   :  { %281 = vtanh.f32 %v265_v7 }
 0x21b   :  { %v200_v1 = vpop.f32.mrf.mxu0 }
 0x21c   :  { %283 = vtanh.f32 %v200_v1 }
 0x227   :  { %v282_v8 = vpop.eup %281 }
 0x228   :  { %212 = vst.msk [vmem:[#allocation3 + $0x8] sm:$0xff] %vm40_vm0, %v282_v8 }
 0x229   :  { %v284_v4 = vpop.eup %283 }
 0x22a   :  { %211 = vst.msk [vmem:[#allocation3] sm:$0xff] %vm40_vm0, %v284_v4 }
 0x22b   :  { %296 = shalt.err (!%p293_p4)
}
 0x22c   :  { %s310_s24 = smov 128   ;;  %s311_s25 = smov 8  }
 0x22d   :  { %224 = dma.vmem_to_hbm [thread:$0]  %s219_s5, 256, %s423_s4, [#allocation4], %s310_s24, %s310_s24, %s311_s25  }
 0x22e   :  { %305 = dma.done.wait [#allocation4], 256  }
 0x22f   :  { %306 = vsyncadd [#allocation4], 4294967040 }
 0x230   :  { %232 = vsyncpa [#allocation4], 1 }

</bundles_post_ra>
